<compile_context>
chip_gen: v7x
topology: tpu7x:2x2x1
jax: 0.10.0
libtpu: 0.0.40
codegen_flags: <defaults>
</compile_context>

<pallas_src>
import functools

import jax
import jax.numpy as jnp
from jax import lax
from jax.experimental import pallas as pl
from jax.experimental.pallas import tpu as pltpu


def _vmem_capacity_bytes():
    try:
        return int(pltpu.get_tpu_info().vmem_capacity_bytes)
    except Exception:
        return 64 * 1024 * 1024  # v7x-safe fallback


def _pick_tile_rows(n_rows, per_row_bytes, fixed_bytes, vmem_cap, itemsize,
                    requested=None, max_rows=8192):
    """Largest sample tile that keeps double-buffered input + f32 temporaries +
    resident output blocks inside a conservative fraction of this generation's
    VMEM.  Rounded to the dtype's sublane packing / 256 (MXU contraction)."""
    budget = int(vmem_cap * 0.45)
    avail = max(budget - int(fixed_bytes), 0)
    tn = avail // max(int(per_row_bytes), 1)
    tn = min(tn, max_rows, max(int(n_rows), 1))
    if requested is not None:
        tn = min(tn, int(requested))
    packing = max(8, 32 // max(int(itemsize), 1))   # f32->8, bf16->16, int8->32
    if tn >= 256:
        tn = (tn // 256) * 256
    else:
        tn = max(packing, (tn // packing) * packing)
    return int(tn)


# ---------------------------------------------------------------------------
# Non-batched kernel: x block is (tile_n, D).
# grid = (P sample-partitions [parallel], T sample tiles [arbitrary]).
# Outputs (all f32, accumulated in the resident out blocks):
#   gram (P, D, D), A = sum_n (sum_i x^2)^2, S2 = sum x^2, S4 = sum x^4.
# ---------------------------------------------------------------------------
def _decorr_kernel_2d(n_valid, tile_n, tiles_per_part, need_mask, mm_dtype,
                      x_ref, gram_ref, a_ref, s2_ref, s4_ref):
    p = pl.program_id(0)
    t = pl.program_id(1)

    @pl.when(t == 0)
    def _():
        gram_ref[...] = jnp.zeros_like(gram_ref)
        a_ref[...] = jnp.zeros_like(a_ref)
        s2_ref[...] = jnp.zeros_like(s2_ref)
        s4_ref[...] = jnp.zeros_like(s4_ref)

    xb = x_ref[...]                                           # (tn, d), native dtype
    if need_mask:
        # Select (not multiply): padded rows of a ragged/overhanging block hold
        # uninitialized data (NaN in interpret mode); select discards it.
        rows = ((p * tiles_per_part + t) * tile_n
                + lax.broadcasted_iota(jnp.int32, (tile_n, 1), 0))
        xb = jnp.where(rows < n_valid, xb, jnp.zeros_like(xb))

    # X^T X on the MXU, f32 accumulation directly into the resident output.
    # TODO(synk): verify with pl.lower_as_mlir that the dim-0 contraction does
    # not emit a per-step vxpose of the (tn, D) tile; if it does, restage lhs.
    xm = xb if mm_dtype is None else xb.astype(mm_dtype)
    gram_ref[...] += lax.dot_general(
        xm, xm, (((0,), (0,)), ((), ())),
        preferred_element_type=jnp.float32)

    xf = xb.astype(jnp.float32)
    x2 = xf * xf
    x4 = x2 * x2
    rs2 = jnp.sum(x2, axis=1, keepdims=True)                  # (tn, 1)
    a_ref[...] += jnp.sum(rs2 * rs2, keepdims=True)           # (1, 1) blocks
    s2_ref[...] += jnp.sum(x2, keepdims=True)
    s4_ref[...] += jnp.sum(x4, keepdims=True)


# ---------------------------------------------------------------------------
# Batched kernel (head-chunked, lane-folded): y is x viewed as (N, D*K);
# each grid step loads a lane-aligned (tile_n, chunk_w) slab (chunk_w = heads
# per chunk * K) and accumulates its dense Gram plus per-head loss partials.
# grid = (head chunks [parallel], sample tiles [arbitrary]).
# ---------------------------------------------------------------------------
def _decorr_kernel_batched(n_valid, w_valid, tile_n, chunk_w,
                           need_row_mask, need_lane_mask, mm_dtype,
                           m_ref, y_ref, gram_ref, a_ref, s2_ref, s4_ref):
    c = pl.program_id(0)
    t = pl.program_id(1)

    @pl.when(t == 0)
    def _():
        gram_ref[...] = jnp.zeros_like(gram_ref)
        a_ref[...] = jnp.zeros_like(a_ref)
        s2_ref[...] = jnp.zeros_like(s2_ref)
        s4_ref[...] = jnp.zeros_like(s4_ref)

    yb = y_ref[...]                                           # (tn, cw)
    if need_row_mask:
        rows = t * tile_n + lax.broadcasted_iota(jnp.int32, (tile_n, 1), 0)
        yb = jnp.where(rows < n_valid, yb, jnp.zeros_like(yb))
    if need_lane_mask:
        lanes = c * chunk_w + lax.broadcasted_iota(jnp.int32, (1, chunk_w), 1)
        yb = jnp.where(lanes < w_valid, yb, jnp.zeros_like(yb))

    ym = yb if mm_dtype is None else yb.astype(mm_dtype)
    gram_ref[...] += lax.dot_general(
        ym, ym, (((0,), (0,)), ((), ())),
        preferred_element_type=jnp.float32)

    yf = yb.astype(jnp.float32)
    x2 = yf * yf
    x4 = x2 * x2
    # Per-row, per-head sums of x^2 via the small block-indicator matmul.
    rh = jnp.dot(x2, m_ref[...], preferred_element_type=jnp.float32)  # (tn, ch)
    a_ref[...] += jnp.sum(rh * rh, keepdims=True)
    s2_ref[...] += jnp.sum(x2, keepdims=True)                 # f32 elementwise S2
    s4_ref[...] += jnp.sum(x4, keepdims=True)


# ---------------------------------------------------------------------------
# Wrapper (mirrors DecorrLoss.forward semantics)
# ---------------------------------------------------------------------------
def decorr_loss(x, kappa, compute_grad=True, compute_loss=True, batched=False,
                tile_n=None, num_partitions=None, matmul_dtype=None):
    if not compute_grad and not compute_loss:
        return None, None, None
    assert kappa is not None, 'Specify kappa for loss and gradient computation'
    if isinstance(kappa, (int, float)):
        assert 0.0 <= float(kappa) <= 1.0, 'kappa must be between 0 and 1'

    x = jnp.asarray(x)
    if not jnp.issubdtype(x.dtype, jnp.floating):
        x = x.astype(jnp.float32)
    itemsize = x.dtype.itemsize

    vmem_cap = _vmem_capacity_bytes()
    vmem_limit = int(min(vmem_cap * 0.9, 100 * 1024 * 1024))

    def _cparams(sem):
        return pltpu.CompilerParams(dimension_semantics=sem,
                                    vmem_limit_bytes=vmem_limit)

    if not batched:
        assert x.ndim == 2, 'Wrong input dimensionality for non-batched mode'
        n, d = x.shape
        fixed = 2 * d * d * 4 + (1 << 20)                     # resident gram + slack
        per_row = d * (2 * itemsize + 20)                     # 2 input bufs + f32 temps
        tn = _pick_tile_rows(n, per_row, fixed, vmem_cap, itemsize,
                             requested=tile_n)
        total_tiles = -(-n // tn)
        # Leading "parallel" partition axis feeds v7x's second TensorCore;
        # harmless (sequential) on v5e/v6e.
        P = num_partitions if num_partitions else (2 if total_tiles >= 2 else 1)
        P = max(1, min(int(P), total_tiles))
        tpp = -(-total_tiles // P)
        need_mask = (P * tpp * tn) != n

        def x_map(p, t):
            # Clamp overhanging tiles of the last partition to a valid block
            # (their rows are zeroed in-kernel via the row mask).
            return (jnp.minimum(p * tpp + t, total_tiles - 1), 0)

        kern = functools.partial(_decorr_kernel_2d, int(n), tn, tpp,
                                 need_mask, matmul_dtype)
        # TODO(synk): if profiling shows exposed DMA on v5e at large tiles, add
        # pipeline_mode=pl.Buffered(3) to the x BlockSpec.
        gram, a_p, s2_p, s4_p = pl.pallas_call(
            kern,
            out_shape=(jax.ShapeDtypeStruct((P, d, d), jnp.float32),
                       jax.ShapeDtypeStruct((P, 1, 1), jnp.float32),
                       jax.ShapeDtypeStruct((P, 1, 1), jnp.float32),
                       jax.ShapeDtypeStruct((P, 1, 1), jnp.float32)),
            grid=(P, tpp),
            in_specs=[pl.BlockSpec((tn, d), x_map)],
            out_specs=(pl.BlockSpec((None, d, d), lambda p, t: (p, 0, 0)),
                       pl.BlockSpec((None, 1, 1), lambda p, t: (p, 0, 0)),
                       pl.BlockSpec((None, 1, 1), lambda p, t: (p, 0, 0)),
                       pl.BlockSpec((None, 1, 1), lambda p, t: (p, 0, 0))),
            compiler_params=_cparams(("parallel", "arbitrary")),
        )(x)

        nf = float(n)
        G = jnp.sum(gram, axis=0) * (1.0 / nf)                # (d, d)
        eye = jnp.eye(d, dtype=jnp.float32)
        diagG = G * eye
        grad = (1.0 - kappa) * (G - diagG) + kappa * (diagG - eye)
        A = jnp.sum(a_p)
        S2 = jnp.sum(s2_p)
        S4 = jnp.sum(s4_p)
        scale = 1.0 / (nf * d * d)
        corr = (A - S4) * scale
        whit = (S4 - 2.0 * S2 + nf * d) * scale

    else:
        assert x.ndim == 3, 'Wrong input dimensionality for batched mode'
        n, d, k = x.shape

        def _heads_per_chunk(kk):
            if kk <= 128 and 128 % kk == 0:
                return 128 // kk
            if kk <= 256 and 256 % kk == 0:
                return 256 // kk
            if kk % 128 == 0:
                return 1
            return None

        k_pad = k
        xw = x
        ch = _heads_per_chunk(k)
        if ch is None:
            # Rare path: K does not tile the 128-lane vreg; zero-pad features
            # once (single HBM copy) so head chunks are lane-aligned.
            k_pad = (1 << (k - 1).bit_length()) if k < 128 else (-(-k // 128) * 128)
            xw = jnp.pad(x, ((0, 0), (0, 0), (0, k_pad - k)))
            ch = _heads_per_chunk(k_pad)
        ch = min(ch, d)
        cw = ch * k_pad
        num_chunks = -(-d // ch)
        w = d * k_pad
        y = xw.reshape(n, w)                                  # free view, no HBM transpose
        need_lane_mask = (num_chunks * cw) != w

        # Lane -> local-head indicator (same for every chunk), resident in VMEM.
        lane = jnp.arange(cw)[:, None] // k_pad
        head = jnp.arange(ch)[None, :]
        m_ind = (lane == head).astype(jnp.float32)            # (cw, ch)

        fixed = 2 * cw * cw * 4 + cw * ch * 4 + (1 << 20)
        per_row = cw * (2 * itemsize + 20) + ch * 8
        tn = _pick_tile_rows(n, per_row, fixed, vmem_cap, itemsize,
                             requested=tile_n)
        T = -(-n // tn)
        need_row_mask = (T * tn) != n

        # TODO(synk): sample-range partitioning (second parallel axis) for v7x
        # when num_chunks == 1; the chunk axis already parallelises otherwise.
        kern = functools.partial(_decorr_kernel_batched, int(n), w, tn, cw,
                                 need_row_mask, need_lane_mask, matmul_dtype)
        gram, a_p, s2_p, s4_p = pl.pallas_call(
            kern,
            out_shape=(jax.ShapeDtypeStruct((num_chunks, cw, cw), jnp.float32),
                       jax.ShapeDtypeStruct((num_chunks, 1, 1), jnp.float32),
                       jax.ShapeDtypeStruct((num_chunks, 1, 1), jnp.float32),
                       jax.ShapeDtypeStruct((num_chunks, 1, 1), jnp.float32)),
            grid=(num_chunks, T),
            in_specs=[pl.BlockSpec((cw, ch), lambda c, t: (0, 0)),
                      pl.BlockSpec((tn, cw), lambda c, t: (t, c))],
            out_specs=(pl.BlockSpec((None, cw, cw), lambda c, t: (c, 0, 0)),
                       pl.BlockSpec((None, 1, 1), lambda c, t: (c, 0, 0)),
                       pl.BlockSpec((None, 1, 1), lambda c, t: (c, 0, 0)),
                       pl.BlockSpec((None, 1, 1), lambda c, t: (c, 0, 0))),
            compiler_params=_cparams(("parallel", "arbitrary")),
        )(m_ind, y)

        nf = float(n)
        Gc = gram * (1.0 / nf)                                # (nc, cw, cw)
        # Gather the per-head K x K diagonal blocks (tiny, done in plain JAX).
        G5 = Gc.reshape(num_chunks, ch, k_pad, ch, k_pad)
        blocks = jnp.diagonal(G5, axis1=1, axis2=3)           # (nc, kp, kp, ch)
        blocks = jnp.moveaxis(blocks, -1, 1)                  # (nc, ch, kp, kp)
        blocks = blocks.reshape(num_chunks * ch, k_pad, k_pad)[:d, :k, :k]
        eye_k = jnp.eye(k, dtype=jnp.float32)
        diagB = blocks * eye_k
        grad = (1.0 - kappa) * (blocks - diagB) + kappa * (diagB - eye_k)
        A = jnp.sum(a_p)
        S2 = jnp.sum(s2_p)
        S4 = jnp.sum(s4_p)
        scale = 1.0 / (nf * d * k * k)
        corr = (A - S4) * scale
        whit = (S4 - 2.0 * S2 + nf * d * k) * scale

    grad_out = grad if compute_grad else None
    corr_out = corr if compute_loss else None
    whit_out = whit if compute_loss else None
    return grad_out, corr_out, whit_out


# ---------------------------------------------------------------------------
# Pure-JAX reference (direct transcription of the PyTorch forward)
# ---------------------------------------------------------------------------
def _decorr_loss_ref(x, kappa, batched):
    x = jnp.asarray(x, jnp.float32)
    if not batched:
        n, d = x.shape
        D = jax.vmap(jnp.diag)(x ** 2)                        # (n, d, d)
        V = D - jnp.eye(d)
        xx_t = jnp.einsum('ni,nj->nij', x, x)
        C = xx_t - D
        corr = jnp.mean(jnp.mean(C ** 2, axis=(1, 2)))
        whit = jnp.mean(jnp.mean(V ** 2, axis=(1, 2)))
        grad = jnp.mean((1 - kappa) * C + kappa * V, axis=0)
        return grad, corr, whit
    else:
        n, d, k = x.shape
        xt = jnp.transpose(x, (1, 0, 2))                      # (d, n, k)
        D = jax.vmap(jax.vmap(jnp.diag))(xt ** 2)             # (d, n, k, k)
        V = D - jnp.eye(k)
        xx_t = jnp.einsum('dni,dnj->dnij', xt, xt)
        C = xx_t - D
        corr = jnp.mean(jnp.mean(jnp.mean(C ** 2, axis=(2, 3)), axis=1))
        whit = jnp.mean(jnp.mean(jnp.mean(V ** 2, axis=(2, 3)), axis=1))
        grad = jnp.mean((1 - kappa) * C + kappa * V, axis=1)
        return grad, corr, whit


if __name__ == "__main__":
    key = jax.random.PRNGKey(0)
    k1, k2, k3, k4 = jax.random.split(key, 4)
    kappa = 0.5

    # Non-batched: (n_samples, D); ragged tiles + 2-way sample partitioning.
    x2d = jax.random.normal(k1, (200, 64), dtype=jnp.float32)
    grad2d, corr2d, whit2d = decorr_loss(x2d, kappa, batched=False, tile_n=64)
    jax.block_until_ready((grad2d, corr2d, whit2d))
    rg, rc, rw = _decorr_loss_ref(x2d, kappa, batched=False)
    assert jnp.allclose(grad2d, rg, atol=1e-4, rtol=1e-4)
    assert jnp.allclose(corr2d, rc, atol=1e-4, rtol=1e-4)
    assert jnp.allclose(whit2d, rw, atol=1e-4, rtol=1e-4)

    # Non-batched, bf16 streaming path with auto-sized tiles (loose tolerance).
    grad_bf, corr_bf, whit_bf = decorr_loss(
        x2d.astype(jnp.bfloat16), kappa, batched=False)
    jax.block_until_ready((grad_bf, corr_bf, whit_bf))
    assert jnp.allclose(grad_bf, rg, atol=1e-1, rtol=1e-1)
    assert jnp.allclose(corr_bf, rc, atol=1e-1, rtol=1e-1)
    assert jnp.allclose(whit_bf, rw, atol=1e-1, rtol=1e-1)

    # Batched, single lane-folded chunk (D*K small), ragged sample tiles.
    x3d = jax.random.normal(k2, (50, 4, 16), dtype=jnp.float32)
    grad3d, corr3d, whit3d = decorr_loss(x3d, kappa, batched=True, tile_n=16)
    jax.block_until_ready((grad3d, corr3d, whit3d))
    rg3, rc3, rw3 = _decorr_loss_ref(x3d, kappa, batched=True)
    assert jnp.allclose(grad3d, rg3, atol=1e-4, rtol=1e-4)
    assert jnp.allclose(corr3d, rc3, atol=1e-4, rtol=1e-4)
    assert jnp.allclose(whit3d, rw3, atol=1e-4, rtol=1e-4)

    # Batched, lane-aligned head chunks (K=32 -> 4 heads / 128-lane chunk).
    x3d_big = jax.random.normal(k3, (24, 40, 32), dtype=jnp.float32)
    grad3b, corr3b, whit3b = decorr_loss(x3d_big, kappa, batched=True)
    jax.block_until_ready((grad3b, corr3b, whit3b))
    rg3b, rc3b, rw3b = _decorr_loss_ref(x3d_big, kappa, batched=True)
    assert jnp.allclose(grad3b, rg3b, atol=1e-4, rtol=1e-4)
    assert jnp.allclose(corr3b, rc3b, atol=1e-4, rtol=1e-4)
    assert jnp.allclose(whit3b, rw3b, atol=1e-4, rtol=1e-4)

    # Batched, K not dividing 128 -> zero-padded-K fallback + lane masking.
    x3d_odd = jax.random.normal(k4, (36, 10, 24), dtype=jnp.float32)
    grad3o, corr3o, whit3o = decorr_loss(x3d_odd, kappa, batched=True)
    jax.block_until_ready((grad3o, corr3o, whit3o))
    rg3o, rc3o, rw3o = _decorr_loss_ref(x3d_odd, kappa, batched=True)
    assert jnp.allclose(grad3o, rg3o, atol=1e-4, rtol=1e-4)
    assert jnp.allclose(corr3o, rc3o, atol=1e-4, rtol=1e-4)
    assert jnp.allclose(whit3o, rw3o, atol=1e-4, rtol=1e-4)

    # Flag semantics (no-compute path returns Nones, like the PyTorch module).
    assert decorr_loss(x2d, kappa, compute_grad=False, compute_loss=False,
                       batched=False) == (None, None, None)

    print("KERNEL_OK")
</pallas_src>

<mosaic_0001>
module attributes {stable_mosaic.version = 11 : i64} {
  func.func @_decorr_kernel_2d(%arg0: i32, %arg1: i32, %arg2: memref<64x64xf32, #tpu.memory_space<vmem>>, %arg3: memref<1x64x64xf32, #tpu.memory_space<vmem>>, %arg4: memref<1x1x1xf32, #tpu.memory_space<vmem>>, %arg5: memref<1x1x1xf32, #tpu.memory_space<vmem>>, %arg6: memref<1x1x1xf32, #tpu.memory_space<vmem>>) attributes {dimension_semantics = [#tpu.dimension_semantics<parallel>, #tpu.dimension_semantics<arbitrary>], iteration_bounds = array<i64: 2, 2>, scalar_prefetch = 0 : i64, scratch_operands = 0 : i64, tpu.core_type = #tpu.core_type<tc>, window_params = [{transform_indices = @transform_0, window_bounds = array<i64: 64, 64>}, {transform_indices = @transform_1, window_bounds = array<i64: 1, 64, 64>}, {transform_indices = @transform_2, window_bounds = array<i64: 1, 1, 1>}, {transform_indices = @transform_3, window_bounds = array<i64: 1, 1, 1>}, {transform_indices = @transform_4, window_bounds = array<i64: 1, 1, 1>}]} {
    %c0_i32 = arith.constant 0 : i32
    %0 = arith.cmpi eq, %arg1, %c0_i32 : i32
    %1 = arith.extui %0 : i1 to i32
    %c0_i32_0 = arith.constant 0 : i32
    %2 = arith.cmpi ne, %1, %c0_i32_0 : i32
    scf.if %2 {
      %cst_31 = arith.constant 0.000000e+00 : f32
      %61 = vector.broadcast %cst_31 : f32 to vector<64x64xf32>
      %c0_32 = arith.constant 0 : index
      %c0_33 = arith.constant 0 : index
      %c0_34 = arith.constant 0 : index
      %62 = vector.load %arg3[%c0_32, %c0_33, %c0_34] : memref<1x64x64xf32, #tpu.memory_space<vmem>>, vector<1x64x64xf32>
      %63 = vector.shape_cast %62 : vector<1x64x64xf32> to vector<64x64xf32>
      %64 = vector.shape_cast %61 : vector<64x64xf32> to vector<1x64x64xf32>
      tpu.vector_store %arg3[%c0_32, %c0_33, %c0_34], %64 {strides = array<i32>} : memref<1x64x64xf32, #tpu.memory_space<vmem>>, vector<1x64x64xf32>,
      %cst_35 = arith.constant 0.000000e+00 : f32
      %65 = vector.broadcast %cst_35 : f32 to vector<1x1xf32>
      %c0_36 = arith.constant 0 : index
      %c0_37 = arith.constant 0 : index
      %c0_38 = arith.constant 0 : index
      %66 = vector.load %arg4[%c0_36, %c0_37, %c0_38] : memref<1x1x1xf32, #tpu.memory_space<vmem>>, vector<1x1x1xf32>
      %67 = vector.shape_cast %66 : vector<1x1x1xf32> to vector<1x1xf32>
      %68 = vector.shape_cast %65 : vector<1x1xf32> to vector<1x1x1xf32>
      tpu.vector_store %arg4[%c0_36, %c0_37, %c0_38], %68 {strides = array<i32>} : memref<1x1x1xf32, #tpu.memory_space<vmem>>, vector<1x1x1xf32>,
      %cst_39 = arith.constant 0.000000e+00 : f32
      %69 = vector.broadcast %cst_39 : f32 to vector<1x1xf32>
      %c0_40 = arith.constant 0 : index
      %c0_41 = arith.constant 0 : index
      %c0_42 = arith.constant 0 : index
      %70 = vector.load %arg5[%c0_40, %c0_41, %c0_42] : memref<1x1x1xf32, #tpu.memory_space<vmem>>, vector<1x1x1xf32>
      %71 = vector.shape_cast %70 : vector<1x1x1xf32> to vector<1x1xf32>
      %72 = vector.shape_cast %69 : vector<1x1xf32> to vector<1x1x1xf32>
      tpu.vector_store %arg5[%c0_40, %c0_41, %c0_42], %72 {strides = array<i32>} : memref<1x1x1xf32, #tpu.memory_space<vmem>>, vector<1x1x1xf32>,
      %cst_43 = arith.constant 0.000000e+00 : f32
      %73 = vector.broadcast %cst_43 : f32 to vector<1x1xf32>
      %c0_44 = arith.constant 0 : index
      %c0_45 = arith.constant 0 : index
      %c0_46 = arith.constant 0 : index
      %74 = vector.load %arg6[%c0_44, %c0_45, %c0_46] : memref<1x1x1xf32, #tpu.memory_space<vmem>>, vector<1x1x1xf32>
      %75 = vector.shape_cast %74 : vector<1x1x1xf32> to vector<1x1xf32>
      %76 = vector.shape_cast %73 : vector<1x1xf32> to vector<1x1x1xf32>
      tpu.vector_store %arg6[%c0_44, %c0_45, %c0_46], %76 {strides = array<i32>} : memref<1x1x1xf32, #tpu.memory_space<vmem>>, vector<1x1x1xf32>,
    } else {
    }
    %c0 = arith.constant 0 : index
    %c0_1 = arith.constant 0 : index
    %3 = vector.load %arg2[%c0, %c0_1] : memref<64x64xf32, #tpu.memory_space<vmem>>, vector<64x64xf32>
    %c2_i32 = arith.constant 2 : i32
    %4 = arith.muli %arg0, %c2_i32 : i32
    %5 = arith.addi %4, %arg1 : i32
    %c64_i32 = arith.constant 64 : i32
    %6 = arith.muli %5, %c64_i32 : i32
    %7 = tpu.iota {dimensions = array<i32: 0>} : vector<64x1xi32>
    %8 = vector.broadcast %6 : i32 to vector<64x1xi32>
    %9 = arith.addi %8, %7 : vector<64x1xi32>
    %c200_i32 = arith.constant 200 : i32
    %10 = vector.broadcast %c200_i32 : i32 to vector<64x1xi32>
    %11 = arith.cmpi slt, %9, %10 : vector<64x1xi32>
    %cst = arith.constant 0.000000e+00 : f32
    %12 = vector.broadcast %cst : f32 to vector<64x64xf32>
    %13 = vector.shape_cast %11 : vector<64x1xi1> to vector<64x1xi1>
    %14 = vector.broadcast %13 : vector<64x1xi1> to vector<64x64xi1>
    %15 = arith.select %14, %3, %12 : vector<64x64xi1>, vector<64x64xf32>
    %c0_2 = arith.constant 0 : index
    %c0_3 = arith.constant 0 : index
    %c0_4 = arith.constant 0 : index
    %16 = vector.load %arg3[%c0_2, %c0_3, %c0_4] : memref<1x64x64xf32, #tpu.memory_space<vmem>>, vector<1x64x64xf32>
    %17 = vector.shape_cast %16 : vector<1x64x64xf32> to vector<64x64xf32>
    %cst_5 = arith.constant dense<0.000000e+00> : vector<64x64xf32>
    %18 = tpu.matmul %15, %15, %cst_5 {dimension_numbers = #tpu.dot_dimension_numbers<[0], [0], [1], [1], [0, 1, 1, 1], [], []>} : vector<64x64xf32>, vector<64x64xf32>, vector<64x64xf32> -> vector<64x64xf32>
    %19 = arith.addf %17, %18 : vector<64x64xf32>
    %c0_6 = arith.constant 0 : index
    %c0_7 = arith.constant 0 : index
    %c0_8 = arith.constant 0 : index
    %20 = vector.load %arg3[%c0_6, %c0_7, %c0_8] : memref<1x64x64xf32, #tpu.memory_space<vmem>>, vector<1x64x64xf32>
    %21 = vector.shape_cast %20 : vector<1x64x64xf32> to vector<64x64xf32>
    %22 = vector.shape_cast %19 : vector<64x64xf32> to vector<1x64x64xf32>
    tpu.vector_store %arg3[%c0_6, %c0_7, %c0_8], %22 {strides = array<i32>} : memref<1x64x64xf32, #tpu.memory_space<vmem>>, vector<1x64x64xf32>,
    %23 = arith.mulf %15, %15 : vector<64x64xf32>
    %24 = arith.mulf %23, %23 : vector<64x64xf32>
    %cst_9 = arith.constant dense<0.000000e+00> : vector<64xf32>
    %25 = vector.multi_reduction <add>, %23, %cst_9 [1] : vector<64x64xf32> to vector<64xf32>
    %26 = vector.shape_cast %25 : vector<64xf32> to vector<64x1xf32>
    %c0_10 = arith.constant 0 : index
    %c0_11 = arith.constant 0 : index
    %c0_12 = arith.constant 0 : index
    %27 = vector.load %arg4[%c0_10, %c0_11, %c0_12] : memref<1x1x1xf32, #tpu.memory_space<vmem>>, vector<1x1x1xf32>
    %28 = vector.shape_cast %27 : vector<1x1x1xf32> to vector<1x1xf32>
    %29 = arith.mulf %26, %26 : vector<64x1xf32>
    %30 = vector.shape_cast %29 : vector<64x1xf32> to vector<1x64x1xf32>
    %cst_13 = arith.constant dense<0.000000e+00> : vector<1xf32>
    %31 = vector.multi_reduction <add>, %30, %cst_13 [1, 2] : vector<1x64x1xf32> to vector<1xf32>
    %32 = vector.shape_cast %31 : vector<1xf32> to vector<1x1x1xf32>
    %33 = vector.extract %32[0, 0, 0] : f32 from vector<1x1x1xf32>
    %34 = vector.broadcast %33 : f32 to vector<1x1xf32>
    %35 = arith.addf %28, %34 : vector<1x1xf32>
    %c0_14 = arith.constant 0 : index
    %c0_15 = arith.constant 0 : index
    %c0_16 = arith.constant 0 : index
    %36 = vector.load %arg4[%c0_14, %c0_15, %c0_16] : memref<1x1x1xf32, #tpu.memory_space<vmem>>, vector<1x1x1xf32>
    %37 = vector.shape_cast %36 : vector<1x1x1xf32> to vector<1x1xf32>
    %38 = vector.shape_cast %35 : vector<1x1xf32> to vector<1x1x1xf32>
    tpu.vector_store %arg4[%c0_14, %c0_15, %c0_16], %38 {strides = array<i32>} : memref<1x1x1xf32, #tpu.memory_space<vmem>>, vector<1x1x1xf32>,
    %c0_17 = arith.constant 0 : index
    %c0_18 = arith.constant 0 : index
    %c0_19 = arith.constant 0 : index
    %39 = vector.load %arg5[%c0_17, %c0_18, %c0_19] : memref<1x1x1xf32, #tpu.memory_space<vmem>>, vector<1x1x1xf32>
    %40 = vector.shape_cast %39 : vector<1x1x1xf32> to vector<1x1xf32>
    %41 = vector.shape_cast %23 : vector<64x64xf32> to vector<1x64x64xf32>
    %cst_20 = arith.constant dense<0.000000e+00> : vector<1xf32>
    %42 = vector.multi_reduction <add>, %41, %cst_20 [1, 2] : vector<1x64x64xf32> to vector<1xf32>
    %43 = vector.shape_cast %42 : vector<1xf32> to vector<1x1x1xf32>
    %44 = vector.extract %43[0, 0, 0] : f32 from vector<1x1x1xf32>
    %45 = vector.broadcast %44 : f32 to vector<1x1xf32>
    %46 = arith.addf %40, %45 : vector<1x1xf32>
    %c0_21 = arith.constant 0 : index
    %c0_22 = arith.constant 0 : index
    %c0_23 = arith.constant 0 : index
    %47 = vector.load %arg5[%c0_21, %c0_22, %c0_23] : memref<1x1x1xf32, #tpu.memory_space<vmem>>, vector<1x1x1xf32>
    %48 = vector.shape_cast %47 : vector<1x1x1xf32> to vector<1x1xf32>
    %49 = vector.shape_cast %46 : vector<1x1xf32> to vector<1x1x1xf32>
    tpu.vector_store %arg5[%c0_21, %c0_22, %c0_23], %49 {strides = array<i32>} : memref<1x1x1xf32, #tpu.memory_space<vmem>>, vector<1x1x1xf32>,
    %c0_24 = arith.constant 0 : index
    %c0_25 = arith.constant 0 : index
    %c0_26 = arith.constant 0 : index
    %50 = vector.load %arg6[%c0_24, %c0_25, %c0_26] : memref<1x1x1xf32, #tpu.memory_space<vmem>>, vector<1x1x1xf32>
    %51 = vector.shape_cast %50 : vector<1x1x1xf32> to vector<1x1xf32>
    %52 = vector.shape_cast %24 : vector<64x64xf32> to vector<1x64x64xf32>
    %cst_27 = arith.constant dense<0.000000e+00> : vector<1xf32>
    %53 = vector.multi_reduction <add>, %52, %cst_27 [1, 2] : vector<1x64x64xf32> to vector<1xf32>
    %54 = vector.shape_cast %53 : vector<1xf32> to vector<1x1x1xf32>
    %55 = vector.extract %54[0, 0, 0] : f32 from vector<1x1x1xf32>
    %56 = vector.broadcast %55 : f32 to vector<1x1xf32>
    %57 = arith.addf %51, %56 : vector<1x1xf32>
    %c0_28 = arith.constant 0 : index
    %c0_29 = arith.constant 0 : index
    %c0_30 = arith.constant 0 : index
    %58 = vector.load %arg6[%c0_28, %c0_29, %c0_30] : memref<1x1x1xf32, #tpu.memory_space<vmem>>, vector<1x1x1xf32>
    %59 = vector.shape_cast %58 : vector<1x1x1xf32> to vector<1x1xf32>
    %60 = vector.shape_cast %57 : vector<1x1xf32> to vector<1x1x1xf32>
    tpu.vector_store %arg6[%c0_28, %c0_29, %c0_30], %60 {strides = array<i32>} : memref<1x1x1xf32, #tpu.memory_space<vmem>>, vector<1x1x1xf32>,
    return
  }
  func.func @transform_0(%arg0: i32, %arg1: i32) -> (i32, i32) {
    %c2_i32 = arith.constant 2 : i32
    %0 = arith.muli %arg0, %c2_i32 : i32
    %1 = arith.addi %0, %arg1 : i32
    %c3_i32 = arith.constant 3 : i32
    %2 = arith.minsi %1, %c3_i32 : i32
    %c0_i32 = arith.constant 0 : i32
    %c0_i32_0 = arith.constant 0 : i32
    return %2, %c0_i32 : i32, i32
  }
  func.func @transform_1(%arg0: i32, %arg1: i32) -> (i32, i32, i32) {
    %c0_i32 = arith.constant 0 : i32
    %c0_i32_0 = arith.constant 0 : i32
    %c0_i32_1 = arith.constant 0 : i32
    return %arg0, %c0_i32, %c0_i32_0 : i32, i32, i32
  }
  func.func @transform_2(%arg0: i32, %arg1: i32) -> (i32, i32, i32) {
    %c0_i32 = arith.constant 0 : i32
    %c0_i32_0 = arith.constant 0 : i32
    %c0_i32_1 = arith.constant 0 : i32
    return %arg0, %c0_i32, %c0_i32_0 : i32, i32, i32
  }
  func.func @transform_3(%arg0: i32, %arg1: i32) -> (i32, i32, i32) {
    %c0_i32 = arith.constant 0 : i32
    %c0_i32_0 = arith.constant 0 : i32
    %c0_i32_1 = arith.constant 0 : i32
    return %arg0, %c0_i32, %c0_i32_0 : i32, i32, i32
  }
  func.func @transform_4(%arg0: i32, %arg1: i32) -> (i32, i32, i32) {
    %c0_i32 = arith.constant 0 : i32
    %c0_i32_0 = arith.constant 0 : i32
    %c0_i32_1 = arith.constant 0 : i32
    return %arg0, %c0_i32, %c0_i32_0 : i32, i32, i32
  }
}

</mosaic_0001>

<bundles_post_ra>
// kernel: tpu_custom_call.1
= control target key start
LH: loop header
LB: loop body
LE: loop exit
PB: predicated region body
PF: predicated region fallthrough
CT: control target
= control target key end

     0   :  { %10 = vsyncpa [#allocation3], 0  ;;  %s1461_s0 = inlined_call_operand.vmem [shape: f32[200,64], index: 0, kind: input, shape index: {}]   ;;  %s1462_s1 = inlined_call_operand.hbm [shape: f32[2,64,64], index: 1, kind: output, shape index: {0}]   ;;  %s1463_s2 = inlined_call_operand.vmem [shape: f32[2,1,1], index: 2, kind: output, shape index: {1}]   ;;  %s1464_s3 = inlined_call_operand.vmem [shape: f32[2,1,1], index: 3, kind: output, shape index: {2}]   ;;  %s1465_s4 = inlined_call_operand.vmem [shape: f32[2,1,1], index: 4, kind: output, shape index: {3}]  }
   0x1   :  { %12 = vsyncpa [#allocation3 + $0x1], 0  ;;  %s1153_s15 = smov 0   ;;  %s1155_s16 = smov 0  }
   0x2   :  { %s1157_s17 = smov 0   ;;  %s1159_s18 = smov 0  }
   0x3   :  { %s1161_s19 = smov 0   ;;  %s1163_s20 = smov 0  }
   0x4   :  { %s1165_s21 = smov 0   ;;  %s1167_s22 = smov 0  }
   0x5 LB: > { %1470 = sst [smem:[#allocation5_spill]] %s1114_s20  ;;  %s835_s23 = sadd.s32 4294967295, %s1122_s22   ;;  %s1122_s22 = sphi %s1167_s22, %s18_s22   ;;  %s1118_s21 = sphi %s1165_s21, %s1488_s21   ;;  %s1114_s20 = sphi %s1163_s20, %s1487_s20   ;;  %s1110_s19 = sphi %s1161_s19, %s1486_s19   ;;  %s1106_s18 = sphi %s1159_s18, %s1485_s18   ;;  %s1102_s17 = sphi %s1157_s17, %s1491_s17   ;;  %s1098_s16 = sphi %s1155_s16, %s1490_s16   ;;  %s1094_s15 = sphi %s1153_s15, %s1489_s15  }
   0x6   : > { %1471 = sst [smem:[#allocation6_spill]] %s1118_s21  ;;  %s836_s24 = sadd.s32 4294967294, %s1122_s22  }
   0x7   : > { %s27_s25 = sadd.s32 1, %s1114_s20  ;;  %s30_s26 = sadd.s32 1, %s1118_s21 }
   0x8   : > { %p28_p0 = scmp.ge.s32.totalorder %s27_s25, 2  ;;  %p81_p1 = scmp.ne.s32.totalorder %s1102_s17, %s1098_s16 }
   0x9   : > { %p82_p2 = scmp.eq.s32.totalorder %s835_s23, 3  ;;  %p87_p4 = scmp.ne.s32.totalorder %s1098_s16, %s1094_s15 }
   0xa   : > { %s1493_s25 = smov (%p28_p0, %s27_s25), 0  ;;  %s1495_s26 = smov (!%p28_p0, %s30_s26), %s1118_s21 }
   0xb   : > { %1472 = sst [smem:[#allocation7_spill]] %s1493_s25  ;;  %p1202_p3 = por %p82_p2, %p81_p1 }
   0xc   : > { %p32_p5 = scmp.ge.s32.totalorder %s1495_s26, 2  ;;  %p88_p6 = scmp.eq.s32.totalorder %s836_s24, 3 }
   0xd   : > { %p841_p7 = scmp.ge.s32.totalorder %s1122_s22, 1  ;;  %p209_p8 = scmp.lt.s32.totalorder %s1122_s22, 5 }
   0xe   : > { %s1497_s26 = smov (%p32_p5, %s1495_s26), 0  ;;  %p1212_p9 = por %p88_p6, %p87_p4 }
   0xf   : > { %1474 = sst [smem:[#allocation8_spill]] %s1497_s26  ;;  %p210_p10 = pnand %p841_p7, %p209_p8 }
  0x10   : > { %s68_s29 = ssub.s32 %s1118_s21, %s1497_s26  ;;  %s71_s30 = sadd.s32 1, %s1102_s17 }
  0x11   : > { %p69_p11 = scmp.eq.s32.totalorder %s68_s29, 0  ;;  %213 = sbr.rel (%p210_p10) target bundleno = 435 (0x1b3), region = 24 }
  0x12   : > { %s1466_s6 = sand.u32 (!%p210_p10), 1, %s1098_s16   ;;  %s843_s7 = sshll.u32 (!%p210_p10), %s1110_s19, 1 }
  0x13   : > { %s1220_s5 = scalar_select %p69_p11, %s1102_s17, %s71_s30  }
  0x14   : > { %s842_s8 = sshll.u32 (!%p210_p10), %s1466_s6, 6  ;;  %s1227_s9 = sadd.s32 (!%p210_p10), %s1106_s18, %s843_s7 }
  0x15   : > { %p254_p12 = scmp.lt.s32.totalorder (!%p210_p10), %s1227_s9, 3  ;;  %p274_p13 = scmp.lt.s32.totalorder (!%p210_p10), %s1110_s19, 1 }
  0x16   : > { %s1253_s13 = scalar_lea.vmem (!%p210_p10), [#allocation2], %s842_s8  ;;  %p846_p1 = scmp.ne.s32.totalorder (!%p210_p10), %s1106_s18, 0 }
  0x18   : > { %s255_s10 = scalar_select %p254_p12, %s1227_s9, 3 }
  0x19   : > { %s275_s11 = scalar_select %p274_p13, %s1110_s19, 1 }
  0x1a   : > { %s844_s12 = sshll.u32 %s255_s10, 3  ;;  %286 = sbr.rel (%p846_p1) target bundleno = 33 (0x21), region = 28  ;;  %vm287_vm0 = vcmask (!%p846_p1), 523264   ;;  %vm296_vm1 = vcmask (!%p846_p1), 0   ;;  %v1124_v0 = vmov (!%p846_p1), 0.0  }
  0x1b   : > { %p261_p0 = scmp.lt.s32.totalorder %s844_s12, 24  ;;  %s1236_s23 = scalar_lea.vmem %s1463_s2, %s275_s11  ;;  %288 = vst.msk [vmem:[%s1253_s13] sm:$0xff] (!%p846_p1), %vm287_vm0, %v1124_v0  ;;  %289 = vst.msk [vmem:[%s1253_s13 + $0x8] sm:$0xff] (!%p846_p1), %vm287_vm0, %v1124_v0 }
  0x1c   : > { %s1241_s30 = scalar_lea.vmem %s1464_s3, %s275_s11  ;;  %s1246_s26 = scalar_lea.vmem %s1465_s4, %s275_s11  ;;  %290 = vst.msk [vmem:[%s1253_s13 + $0x10] sm:$0xff] (!%p846_p1), %vm287_vm0, %v1124_v0  ;;  %291 = vst.msk [vmem:[%s1253_s13 + $0x18] sm:$0xff] (!%p846_p1), %vm287_vm0, %v1124_v0 }
  0x1d   : > { %s1499_s12 = smov (!%p261_p0, %s844_s12), 24  ;;  %292 = vst.msk [vmem:[%s1253_s13 + $0x20] sm:$0xff] (!%p846_p1), %vm287_vm0, %v1124_v0  ;;  %293 = vst.msk [vmem:[%s1253_s13 + $0x28] sm:$0xff] (!%p846_p1), %vm287_vm0, %v1124_v0 }
  0x1e   : > { %s845_s25 = sshll.u32 %s1499_s12, 3  ;;  %294 = vst.msk [vmem:[%s1253_s13 + $0x30] sm:$0xff] (!%p846_p1), %vm287_vm0, %v1124_v0  ;;  %295 = vst.msk [vmem:[%s1253_s13 + $0x38] sm:$0xff] (!%p846_p1), %vm287_vm0, %v1124_v0 }
  0x1f   : > { %s1251_s20 = scalar_lea.vmem %s1461_s0, %s845_s25  ;;  %297 = vst.msk [vmem:[%s1236_s23] sm:$0x1] (!%p846_p1), %vm296_vm1, %v1124_v0  ;;  %298 = vst.msk [vmem:[%s1241_s30] sm:$0x1] (!%p846_p1), %vm296_vm1, %v1124_v0 }
  0x20   : > { %299 = vst.msk [vmem:[%s1246_s26] sm:$0x1] (!%p846_p1), %vm296_vm1, %v1124_v0 }
  0x21 PF: > { %s848_s18 = sshll.u32 %s1227_s9, 6  ;;  %v311_v1 = vlaneseq  ;;  %v300_v4 = vld [vmem:[%s1251_s20] sm:$0xff]  ;;  %v301_v6 = vld [vmem:[%s1251_s20 + $0x8] sm:$0xff]  ;;  %v302_v14 = vld [vmem:[%s1251_s20 + $0x10] sm:$0xff]  ;;  %vm401_vm3 = vcmask 523264   ;;  %vm596_vm15 = vcmask 7168  }
  0x22   : > { %v320_v2 = vstv %s848_s18  ;;  %v915_v10 = vpack.c.bf16 %v301_v6, %v300_v4  ;;  %v303_v16 = vld [vmem:[%s1251_s20 + $0x18] sm:$0xff]  ;;  %v304_v28 = vld [vmem:[%s1251_s20 + $0x20] sm:$0xff]  ;;  %v305_v29 = vld [vmem:[%s1251_s20 + $0x28] sm:$0xff]  ;;  %s696_s21 = sshll.u32 %s1253_s13, 4  ;;  %s1125_s12 = smov [#allocation2]   ;;  %s1395_s21 = int_to_ptr.vmem [resolvable:$true] %s696_s21 }
  0x23   : > { %v312_v3 = vshrl.u32 %v311_v1, 7  ;;  %v921_v19 = vpack.c.bf16 %v303_v16, %v302_v14  ;;  %v927_v32 = vpack.c.bf16 %v305_v29, %v304_v28  ;;  %v306_v39 = vld [vmem:[%s1251_s20 + $0x30] sm:$0xff]  ;;  %v307_v40 = vld [vmem:[%s1251_s20 + $0x38] sm:$0xff]  ;;  %s870_s20 = sshll.u32 %s1110_s19, 10  ;;  %s1484_s19 = sand.u32 1, %s1098_s16  }
  0x24   : > { %v933_v44 = vpack.c.bf16 %v307_v40, %v306_v39  ;;  %s1393_s8 = scalar_lea.hbm %s1462_s1, %s870_s20  ;;  %s1403_s9 = scalar_lea.sflag [#allocation3], %s1484_s19 }
  0x25   : > { %v321_v5 = vadd.s32 %v320_v2, %v312_v3  ;;  %v313_v7 = vadd.s32 8, %v312_v3  ;;  %v314_v8 = vadd.s32 16, %v312_v3  ;;  %v315_v9 = vadd.s32 24, %v312_v3  ;;  %s1028_s11 = scalar_lea.vmem %s1395_s21, 1024  ;;  %s1032_s14 = sshll.u32 %s1125_s12, 4  ;;  %s1033_s14 = int_to_ptr.vmem [resolvable:$false] %s1032_s14 }
  0x26   : > { %v316_v11 = vadd.s32 32, %v312_v3  ;;  %v317_v12 = vadd.s32 40, %v312_v3  ;;  %v318_v30 = vadd.s32 48, %v312_v3  ;;  %v319_v33 = vadd.s32 56, %v312_v3  ;;  %p1029_p2 = scmp.ne.s32.totalorder %s1395_s21, %s1028_s11  ;;  %s1034_s24 = scalar_lea.vmem %s1033_s14, 2048 }
  0x27   : > { %vm329_vm2 = vcmp.lt.s32.totalorder %v321_v5, 200  ;;  %v322_v13 = vadd.s32 %v320_v2, %v313_v7  ;;  %v323_v15 = vadd.s32 %v320_v2, %v314_v8  ;;  %v324_v17 = vadd.s32 %v320_v2, %v315_v9  ;;  %p1035_p6 = scmp.lt.s32.totalorder %s1395_s21, %s1033_s14  ;;  %p1036_p7 = scmp.lt.s32.totalorder %s1034_s24, %s1028_s11 }
  0x28   : > { %v353_v18 = vsel %vm329_vm2, %v300_v4, 0.0  ;;  %v325_v20 = vadd.s32 %v320_v2, %v316_v11  ;;  %v326_v22 = vadd.s32 %v320_v2, %v317_v12  ;;  %v327_v38 = vadd.s32 %v320_v2, %v318_v30  ;;  %p1030_p4 = pnand %p1029_p2, %p1202_p3 }
  0x29   : > { %v547_v21 = vmul.f32 %v353_v18, %v353_v18  ;;  %vm330_vm4 = vcmp.lt.s32.totalorder %v322_v13, 200  ;;  %369 = vxpose.xlu0.b32.start [1/8] (short) (narrow) %v353_v18, 64  ;;  %vm331_vm5 = vcmp.lt.s32.totalorder %v323_v15, 200  ;;  %vm332_vm6 = vcmp.lt.s32.totalorder %v324_v17, 200  ;;  %p1037_p8 = por %p1036_p7, %p1035_p6 }
  0x2a   : > { %v354_v23 = vsel %vm330_vm4, %v301_v6, 0.0  ;;  %v355_v24 = vsel %vm331_vm5, %v302_v14, 0.0  ;;  %vm1274_vm7 = vmpackc.low %vm330_vm4, %vm329_vm2  ;;  %vm333_vm9 = vcmp.lt.s32.totalorder %v325_v20, 200  ;;  %vm334_vm10 = vcmp.lt.s32.totalorder %v326_v22, 200  ;;  %p1031_p5 = pneg %p1030_p4 }
  0x2b   : > { %v563_v26 = vsel %vm401_vm3, %v547_v21, 0.0  ;;  %v548_v27 = vmul.f32 %v354_v23, %v354_v23  ;;  %917 = vmatprep.subr.msk.bf16.mxu0 %vm1274_vm7, %v915_v10  ;;  %vm1284_vm8 = vmpackc.low %vm332_vm6, %vm331_vm5  ;;  %939 = vmatprep.subr.msk.bf16.mxu1 %vm1274_vm7, %v915_v10  ;;  %v549_v35 = vmul.f32 %v355_v24, %v355_v24  ;;  %v356_v36 = vsel %vm332_vm6, %v303_v16, 0.0 }
  0x2c   : > { %564 = vadd.xlane.f32.xlu1 %v563_v26  ;;  %920 = vmatpush3.bf16.msk.msra.mxu0 %vm1274_vm7, %v915_v10  ;;  %vm1298_vm11 = vmpackc.low %vm334_vm10, %vm333_vm9  ;;  %v550_v42 = vmul.f32 %v356_v36, %v356_v36  ;;  %v328_v43 = vadd.s32 %v320_v2, %v319_v33  ;;  %v357_v45 = vsel %vm333_vm9, %v304_v28, 0.0  ;;  %vm335_vm12 = vcmp.lt.s32.totalorder %v327_v38, 200  ;;  %p1038_p10 = pnand %p1037_p8, %p1031_p5 }
  0x2d   : > { %v566_v34 = vsel %vm401_vm3, %v548_v27, 0.0  ;;  %370 = vxpose.xlu0.b32.cont [2/8] (short) (narrow) %v354_v23, 64  ;;  %923 = vmatprep.subr.msk.bf16.mxu0 %vm1284_vm8, %v921_v19  ;;  %v569_v41 = vsel %vm401_vm3, %v549_v35, 0.0  ;;  %v551_v48 = vmul.f32 %v357_v45, %v357_v45  ;;  %v358_v49 = vsel %vm334_vm10, %v305_v29, 0.0 }
  0x2e   : > { %943 = vmatpush3.bf16.msk.msra.mxu1 %vm1274_vm7, %v915_v10  ;;  %vm336_vm13 = vcmp.lt.s32.totalorder %v328_v43, 200  ;;  %v572_v47 = vsel %vm401_vm3, %v550_v42, 0.0  ;;  %v626_v50 = vadd.f32 %v566_v34, %v563_v26  ;;  %v552_v52 = vmul.f32 %v358_v49, %v358_v49 }
  0x2f   : > { %940 = vmatprep.subr.msk.bf16.mxu1 %vm1284_vm8, %v921_v19  ;;  %vm1322_vm14 = vmpackc.low %vm336_vm13, %vm335_vm12  ;;  %v575_v51 = vsel %vm401_vm3, %v551_v48, 0.0  ;;  %v555_v53 = vmul.f32 %v547_v21, %v547_v21  ;;  %v556_v54 = vmul.f32 %v548_v27, %v548_v27  ;;  %v359_v55 = vsel %vm335_vm12, %v306_v39, 0.0 }
  0x30   : > { %567 = vadd.xlane.f32.xlu1 %v566_v34  ;;  %926 = vmatpush3.bf16.msk.msra.mxu0 %vm1284_vm8, %v921_v19  ;;  %v627_v56 = vadd.f32 %v626_v50, %v569_v41  ;;  %v578_v57 = vsel %vm401_vm3, %v552_v52, 0.0  ;;  %v553_v58 = vmul.f32 %v359_v55, %v359_v55  ;;  %v557_v61 = vmul.f32 %v549_v35, %v549_v35 }
  0x31   : > { %371 = vxpose.xlu0.b32.cont [3/8] (short) (narrow) %v355_v24, 64  ;;  %929 = vmatprep.subr.msk.bf16.mxu0 %vm1298_vm11, %v927_v32  ;;  %v646_v59 = vsel %vm401_vm3, %v555_v53, 0.0  ;;  %v647_v60 = vsel %vm401_vm3, %v556_v54, 0.0  ;;  %v360_v62 = vsel %vm336_vm13, %v307_v40, 0.0  ;;  %v558_v4 = vmul.f32 %v550_v42, %v550_v42 }
  0x32   : > { %944 = vmatpush3.bf16.msk.msra.mxu1 %vm1284_vm8, %v921_v19  ;;  %v628_v63 = vadd.f32 %v627_v56, %v572_v47  ;;  %v648_v0 = vadd.f32 %v647_v60, %v646_v59  ;;  %v581_v1 = vsel %vm401_vm3, %v553_v58, 0.0  ;;  %v554_v2 = vmul.f32 %v360_v62, %v360_v62 }
  0x33   : > { %941 = vmatprep.subr.msk.bf16.mxu1 %vm1298_vm11, %v927_v32  ;;  %v649_v3 = vsel %vm401_vm3, %v557_v61, 0.0  ;;  %v651_v8 = vsel %vm401_vm3, %v558_v4, 0.0  ;;  %v559_v9 = vmul.f32 %v551_v48, %v551_v48  ;;  %v560_v13 = vmul.f32 %v552_v52, %v552_v52 }
  0x34   : > { %570 = vadd.xlane.f32.xlu1 %v569_v41  ;;  %932 = vmatpush3.bf16.msk.msra.mxu0 %vm1298_vm11, %v927_v32  ;;  %v629_v5 = vadd.f32 %v628_v63, %v575_v51  ;;  %v650_v6 = vadd.f32 %v649_v3, %v648_v0  ;;  %v584_v7 = vsel %vm401_vm3, %v554_v2, 0.0  ;;  %v561_v15 = vmul.f32 %v553_v58, %v553_v58 }
  0x35   : > { %372 = vxpose.xlu0.b32.cont [4/8] (short) (narrow) %v356_v36, 64  ;;  %935 = vmatprep.subr.msk.bf16.mxu0 %vm1322_vm14, %v933_v44  ;;  %v653_v12 = vsel %vm401_vm3, %v559_v9, 0.0  ;;  %v655_v17 = vsel %vm401_vm3, %v560_v13, 0.0  ;;  %v562_v20 = vmul.f32 %v554_v2, %v554_v2 }
  0x36   : > { %945 = vmatpush3.bf16.msk.msra.mxu1 %vm1298_vm11, %v927_v32  ;;  %v630_v10 = vadd.f32 %v629_v5, %v578_v57  ;;  %v652_v11 = vadd.f32 %v651_v8, %v650_v6  ;;  %v657_v21 = vsel %vm401_vm3, %v561_v15, 0.0 }
  0x37   : > { %942 = vmatprep.subr.msk.bf16.mxu1 %vm1322_vm14, %v933_v44  ;;  %v659_v23 = vsel %vm401_vm3, %v562_v20, 0.0 }
  0x38   : > { %573 = vadd.xlane.f32.xlu1 %v572_v47  ;;  %938 = vmatpush3.bf16.msk.msra.mxu0 %vm1322_vm14, %v933_v44  ;;  %v631_v14 = vadd.f32 %v630_v10, %v581_v1  ;;  %v654_v16 = vadd.f32 %v653_v12, %v652_v11 }
  0x39   : > { %373 = vxpose.xlu0.b32.cont [5/8] (short) (narrow) %v357_v45, 64 }
  0x3a   : > { %946 = vmatpush3.bf16.msk.msra.mxu1 %vm1322_vm14, %v933_v44  ;;  %v632_v18 = vadd.f32 %v631_v14, %v584_v7  ;;  %v656_v19 = vadd.f32 %v655_v17, %v654_v16 }
  0x3c   : > { %576 = vadd.xlane.f32.xlu1 %v575_v51  ;;  %v658_v22 = vadd.f32 %v657_v21, %v656_v19  ;;  %v362_v21 = vld [vmem:[%s1253_s13 + $0x8] sm:$0xff] }
  0x3d   : > { %374 = vxpose.xlu0.b32.cont [6/8] (short) (narrow) %v358_v49, 64 }
  0x3e   : > { %v660_v24 = vadd.f32 %v659_v23, %v658_v22  ;;  %v361_v22 = vld [vmem:[%s1253_s13] sm:$0xff] }
  0x40   : > { %579 = vadd.xlane.f32.xlu1 %v578_v57 }
  0x41   : > { %375 = vxpose.xlu0.b32.cont [7/8] (short) (narrow) %v359_v55, 64 }
  0x44   : > { %582 = vadd.xlane.f32.xlu1 %v581_v1 }
  0x45   : > { %376 = vxpose.xlu0.b32.end [8/8] (short) (narrow) %v360_v62, 64 }
  0x48   : > { %585 = vadd.xlane.f32.xlu1 %v584_v7 }
  0x4c   : > { %633 = vadd.xlane.f32.xlu1 %v632_v18 }
  0x50   : > { %661 = vadd.xlane.f32.xlu1 %v660_v24 }
  0xa9   : > { %v385_v25 = vpop.trf.xlu0 }
  0xaa   : > { %903 = vmatprep.mubr.msk.f32.mxu0 %vm401_vm3, %v385_v25 }
  0xad   : > { %v386_v26 = vpop.trf.xlu0 }
  0xae   : > { %904 = vmatmul.mubr.msk.f32.vlgmr.msra.gmra.mrb[0].mxu0 %vm401_vm3, %v386_v26 }
  0xb1   : > { %v387_v27 = vpop.trf.xlu0 }
  0xb2   : > { %906 = vmatprep.mubr.msk.f32.mxu0 %vm401_vm3, %v387_v27  ;;  %v364_v27 = vld [vmem:[%s1253_s13 + $0x18] sm:$0xff] }
  0xb5   : > { %v388_v28 = vpop.trf.xlu0 }
  0xb6   : > { %907 = vmatmul.mubr.msk.f32.gmra.mrb[2].mxu0 %vm401_vm3, %v388_v28  ;;  %v363_v28 = vld [vmem:[%s1253_s13 + $0x10] sm:$0xff] }
  0xb9   : > { %v565_v29 = vpop.xlane.xlu1 %564  ;;  %v389_v30 = vpop.trf.xlu0 }
  0xba   : > { %909 = vmatprep.mubr.msk.f32.mxu1 %vm401_vm3, %v389_v30  ;;  %v588_v38 = vmul.f32 %v565_v29, %v565_v29 }
  0xbc   : > { %v597_v43 = vsel %vm596_vm15, %v588_v38, 0.0 }
  0xbd   : > { %v568_v31 = vpop.xlane.xlu1 %567  ;;  %v390_v32 = vpop.trf.xlu0 }
  0xbe   : > { %910 = vmatmul.mubr.msk.f32.vlgmr.msra.gmra.mrb[0].mxu1 %vm401_vm3, %v390_v32  ;;  %v589_v37 = vmul.f32 %v568_v31, %v568_v31 }
  0xc0   : > { %v598_v41 = vsel %vm596_vm15, %v589_v37, 0.0 }
  0xc1   : > { %v571_v33 = vpop.xlane.xlu1 %570  ;;  %v391_v34 = vpop.trf.xlu0  ;;  %v599_v46 = vadd.f32 %v598_v41, %v597_v43 }
  0xc2   : > { %912 = vmatprep.mubr.msk.f32.mxu1 %vm401_vm3, %v391_v34  ;;  %v590_v39 = vmul.f32 %v571_v33, %v571_v33  ;;  %v366_v33 = vld [vmem:[%s1253_s13 + $0x28] sm:$0xff]  ;;  %v365_v34 = vld [vmem:[%s1253_s13 + $0x20] sm:$0xff] }
  0xc4   : > { %v600_v44 = vsel %vm596_vm15, %v590_v39, 0.0  ;;  %v368_v39 = vld [vmem:[%s1253_s13 + $0x38] sm:$0xff] }
  0xc5   : > { %v574_v35 = vpop.xlane.xlu1 %573  ;;  %v392_v36 = vpop.trf.xlu0  ;;  %v601_v50 = vadd.f32 %v600_v44, %v599_v46 }
  0xc6   : > { %913 = vmatmul.mubr.msk.f32.gmra.mrb[2].mxu1 %vm401_vm3, %v392_v36  ;;  %v591_v42 = vmul.f32 %v574_v35, %v574_v35 }
  0xc8   : > { %v602_v48 = vsel %vm596_vm15, %v591_v42, 0.0 }
  0xc9   : > { %v577_v40 = vpop.xlane.xlu1 %576  ;;  %v603_v52 = vadd.f32 %v602_v48, %v601_v50 }
  0xca   : > { %v592_v45 = vmul.f32 %v577_v40, %v577_v40  ;;  %v367_v40 = vld [vmem:[%s1253_s13 + $0x30] sm:$0xff] }
  0xcc   : > { %v604_v51 = vsel %vm596_vm15, %v592_v45, 0.0 }
  0xcd   : > { %v580_v47 = vpop.xlane.xlu1 %579  ;;  %v605_v56 = vadd.f32 %v604_v51, %v603_v52 }
  0xce   : > { %v593_v49 = vmul.f32 %v580_v47, %v580_v47 }
  0xd0   : > { %v606_v54 = vsel %vm596_vm15, %v593_v49, 0.0 }
  0xd1   : > { %v583_v53 = vpop.xlane.xlu1 %582  ;;  %v607_v58 = vadd.f32 %v606_v54, %v605_v56 }
  0xd2   : > { %v594_v55 = vmul.f32 %v583_v53, %v583_v53 }
  0xd4   : > { %v608_v57 = vsel %vm596_vm15, %v594_v55, 0.0 }
  0xd5   : > { %v586_v59 = vpop.xlane.xlu1 %585  ;;  %v609_v61 = vadd.f32 %v608_v57, %v607_v58 }
  0xd6   : > { %v595_v60 = vmul.f32 %v586_v59, %v586_v59 }
  0xd8   : > { %v610_v62 = vsel %vm596_vm15, %v595_v60, 0.0 }
  0xd9   : > { %v611_v63 = vadd.f32 %v610_v62, %v609_v61  ;;  %v634_v0 = vpop.xlane.xlu1 %633 }
  0xda   : > { %v635_v2 = vrot.slane %v634_v0, 4 }
  0xdb   : > { %612 = vadd.xlane.f32.xlu0 %v611_v63 }
  0xdc   : > { %v636_v4 = vadd.f32 %v635_v2, %v634_v0 }
  0xdd   : > { %v662_v1 = vpop.xlane.xlu1 %661 }
  0xde   : > { %v663_v3 = vrot.slane %v662_v1, 4  ;;  %v637_v6 = vrot.slane %v636_v4, 2 }
  0xe0   : > { %v664_v5 = vadd.f32 %v663_v3, %v662_v1  ;;  %v638_v11 = vadd.f32 %v637_v6, %v636_v4 }
  0xe2   : > { %v665_v8 = vrot.slane %v664_v5, 2  ;;  %v639_v15 = vrot.slane %v638_v11, 1 }
  0xe4   : > { %v666_v12 = vadd.f32 %v665_v8, %v664_v5  ;;  %v640_v19 = vadd.f32 %v639_v15, %v638_v11 }
  0xe6   : > { %v667_v17 = vrot.slane %v666_v12, 1 }
  0xe8   : > { %v668_v20 = vadd.f32 %v667_v17, %v666_v12 }
 0x168   : > { %v613_v7 = vpop.xlane.xlu0 %612 }
 0x169   : > { %v614_v9 = vrot.slane %v613_v7, 4 }
 0x16b   : > { %v615_v10 = vadd.f32 %v614_v9, %v613_v7 }
 0x16d   : > { %v616_v13 = vrot.slane %v615_v10, 2 }
 0x16f   : > { %v617_v14 = vadd.f32 %v616_v13, %v615_v10 }
 0x171   : > { %v618_v16 = vrot.slane %v617_v14, 1 }
 0x173   : > { %v619_v18 = vadd.f32 %v618_v16, %v617_v14 }
 0x175   : > { %947 = vpush %v619_v18 }
 0x176   : > { %949 = vpush %v640_v19 }
 0x177   : > { %951 = vpush %v668_v20 }
 0x181   : > { %v905_v23 = vpop.f32.mrb[0].mxu0 }
 0x182   : > { %v532_v24 = vadd.f32 %v905_v23, %v362_v21  ;;  %v492_v25 = vpop.f32.mrb[1].mxu0 }
 0x183   : > { %v531_v26 = vadd.f32 %v492_v25, %v361_v22 }
 0x184   : > { %540 = vst.msk [vmem:[%s1253_s13 + $0x8] sm:$0xff] %vm401_vm3, %v532_v24 }
 0x185   : > { %539 = vst.msk [vmem:[%s1253_s13] sm:$0xff] %vm401_vm3, %v531_v26 }
 0x189   : > { %v908_v29 = vpop.f32.mrb[2].mxu0 }
 0x18a   : > { %v534_v30 = vadd.f32 %v908_v29, %v364_v27  ;;  %v502_v31 = vpop.f32.mrb[3].mxu0 }
 0x18b   : > { %v533_v32 = vadd.f32 %v502_v31, %v363_v28 }
 0x18c   : > { %542 = vst.msk [vmem:[%s1253_s13 + $0x18] sm:$0xff] %vm401_vm3, %v534_v30 }
 0x18d   : > { %541 = vst.msk [vmem:[%s1253_s13 + $0x10] sm:$0xff] %vm401_vm3, %v533_v32 }
 0x191   : > { %v911_v35 = vpop.f32.mrb[0].mxu1 }
 0x192   : > { %v536_v36 = vadd.f32 %v911_v35, %v366_v33  ;;  %v512_v37 = vpop.f32.mrb[1].mxu1 }
 0x193   : > { %v535_v38 = vadd.f32 %v512_v37, %v365_v34 }
 0x194   : > { %544 = vst.msk [vmem:[%s1253_s13 + $0x28] sm:$0xff] %vm401_vm3, %v536_v36 }
 0x195   : > { %543 = vst.msk [vmem:[%s1253_s13 + $0x20] sm:$0xff] %vm401_vm3, %v535_v38 }
 0x199   : > { %v914_v41 = vpop.f32.mrb[2].mxu1 }
 0x19a   : > { %v538_v42 = vadd.f32 %v914_v41, %v368_v39  ;;  %v522_v43 = vpop.f32.mrb[3].mxu1 }
 0x19b   : > { %v537_v44 = vadd.f32 %v522_v43, %v367_v40 }
 0x19c   : > { %546 = vst.msk [vmem:[%s1253_s13 + $0x38] sm:$0xff] %vm401_vm3, %v538_v42 }
 0x19d   : > { %545 = vst.msk [vmem:[%s1253_s13 + $0x30] sm:$0xff] %vm401_vm3, %v537_v44 }
 0x19e   : > { %1041 = shalt.err (!%p1038_p10)
}
 0x19f   : > { %s1042_s29 = scalar_lea.hbm %s1393_s8, 1024  ;;  %s1046_s13 = scalar_lea.hbm %s1462_s1, 2048 }
 0x1a0   : > { %p1043_p11 = scmp.ne.s32.totalorder %s1393_s8, %s1042_s29  ;;  %p1047_p0 = scmp.lt.u32.totalorder %s1393_s8, %s1462_s1 }
 0x1a1   : > { %p1048_p1 = scmp.lt.u32.totalorder %s1046_s13, %s1042_s29  ;;  %p1050_p4 = scmp.lt.u32.totalorder %s1042_s29, %s1393_s8 }
 0x1a2   : > { %p1044_p12 = pnand %p1043_p11, %p1202_p3 }
 0x1a3   : > { %p1049_p2 = por %p1048_p1, %p1047_p0 }
 0x1a4   : > { %p1045_p13 = pneg %p1044_p12 }
 0x1a5   : > { %p1051_p5 = por %p1050_p4, %p1049_p2 }
 0x1a7   : > { %p1052_p6 = pnand %p1051_p5, %p1045_p13 }
 0x1a9   : > { %1055 = shalt.err (!%p1052_p6)
}
 0x1aa   : > { %s1126_s25 = smov 128   ;;  %s1127_s6 = smov 8   ;;  %v587_v45 = vld [vmem:[%s1236_s23] sm:$0x1]  ;;  %vm623_vm0 = vcmask 0  }
 0x1ab   : > { %953 = dma.vmem_to_hbm [thread:$0]  (%p1202_p3), %s1395_s21, 1024, %s1393_s8, %s1403_s9, %s1126_s25, %s1126_s25, %s1127_s6  }
 0x1ac   : > { %s948_s19 = spop %947  ;;  %v625_v46 = vld [vmem:[%s1241_s30] sm:$0x1] }
 0x1ad   : > { %v621_v47 = vstv %s948_s19  ;;  %s950_s11 = spop %949  ;;  %v645_v48 = vld [vmem:[%s1246_s26] sm:$0x1] }
 0x1ae   : > { %v622_v49 = vadd.f32 %v621_v47, %v587_v45  ;;  %v642_v50 = vstv %s950_s11  ;;  %s952_s12 = spop %951 }
 0x1af   : > { %v643_v51 = vadd.f32 %v642_v50, %v625_v46  ;;  %v670_v52 = vstv %s952_s12 }
 0x1b0   : > { %624 = vst.msk [vmem:[%s1236_s23] sm:$0x1] %vm623_vm0, %v622_v49  ;;  %v671_v53 = vadd.f32 %v670_v52, %v645_v48 }
 0x1b1   : > { %644 = vst.msk [vmem:[%s1241_s30] sm:$0x1] %vm623_vm0, %v643_v51 }
 0x1b2   : > { %672 = vst.msk [vmem:[%s1246_s26] sm:$0x1] %vm623_vm0, %v671_v53 }
 0x1b3 PF: > { %p959_p3 = scmp.ge.s32.totalorder %s1122_s22, 2  ;;  %s720_s27 = sand.u32 1, %s1094_s15  }
 0x1b4   : > { %s721_s21 = scalar_lea.sflag [#allocation3], %s720_s27 }
 0x1b5   : > { %p956_p7 = pnand %p959_p3, %p1212_p9 }
 0x1b7   : > { %1089 = dma.done.wait (!%p956_p7), %s721_s21, 1024  }
 0x1b8   : > { %1091 = vsyncadd (!%p956_p7), %s721_s21, 4294966272  ;;  %s18_s22 = sadd.s32 1, %s1122_s22   ;;  %s1485_s18 = sld [smem:[#allocation5_spill]] }
 0x1b9   : > { %p15_p8 = scmp.ge.s32.totalorder %s18_s22, 6   ;;  %s1486_s19 = sld [smem:[#allocation6_spill]] }
 0x1ba   : > { %s1487_s20 = sld [smem:[#allocation7_spill]]  ;;  %s1488_s21 = sld [smem:[#allocation8_spill]] }
 0x1bb   : > { %s1489_s15 = smov %s1098_s16  ;;  %s1490_s16 = smov %s1102_s17 }
 0x1bc   : > { %s1491_s17 = smov %s1220_s5  ;;  %17 = sbr.rel (!%p15_p8) target bundleno = 5 (0x5), region = 99 }
 0x1c3   :  { %744 = vsyncpa [#allocation3], 1 }
 0x1c4   :  { %746 = vsyncpa [#allocation3 + $0x1], 1 }

</bundles_post_ra>
